<compile_context>
chip_gen: v6e
topology: v6e:2x2x1
jax: 0.10.0
libtpu: 0.0.40
codegen_flags: <defaults>
</compile_context>

<pallas_src>
import functools

import jax
import jax.numpy as jnp
from jax import lax
from jax.experimental import pallas as pl
from jax.experimental.pallas import tpu as pltpu


def _mutu_kernel(x_ref, org_ref, out_ref, *, W, LANES, R, TN, need_row_mask):
    """One grid step: (TN, LANES) blocks -> (1, 2, LANES) lane-dense partials.

    out_ref[0, 0, :] = sum_rows f(sh)   with f(s) = s * exp(-10 s)  (h-direction,
                                        within-chunk pairs only)
    out_ref[0, 1, :] = sum_rows f(sw)                               (w-direction)
    """
    x = x_ref[...].astype(jnp.float32)      # (TN, LANES)
    o = org_ref[...].astype(jnp.float32)

    # Hoisted positional masks (single (1, LANES) iota; cheap int VPU work).
    p = lax.broadcasted_iota(jnp.int32, (1, LANES), 1)
    mask_w = (p % W) != 0                   # has a (h, w-1) neighbour in-chunk
    mask_h = p >= W                         # has a (h-1, w) neighbour in-chunk

    if need_row_mask:
        # Last grid block is partial along rows: zero out-of-range rows.
        rows = lax.broadcasted_iota(jnp.int32, (TN, LANES), 0) + pl.program_id(0) * TN
        rvalid = rows < R
        mask_w = jnp.logical_and(mask_w, rvalid)
        mask_h = jnp.logical_and(mask_h, rvalid)

    def tv_partial(shift, mask):
        # roll runs on the XLU slot; exp on the EUP slot; rest is VPU.
        dx = x - pltpu.roll(x, shift=shift, axis=1)
        do = o - pltpu.roll(o, shift=shift, axis=1)
        s = dx * dx + do * do
        s = jnp.where(mask, s, 0.0)         # also kills any garbage rows (NaN-safe)
        f = s * jnp.exp(-10.0 * s)
        return jnp.sum(f, axis=0, keepdims=True)   # (1, LANES): sublane-only reduce

    out_ref[0, 0:1, :] = tv_partial(W, mask_h)     # h-direction
    out_ref[0, 1:2, :] = tv_partial(1, mask_w)     # w-direction


def _plan(N, H, W, block_bytes, lanes_max=8192, min_rows=16):
    """Choose chunk height TH (divisor of H), rows-per-block TN and grid size."""
    divs = [d for d in range(1, H + 1) if H % d == 0]
    cands = [d for d in divs if d * W <= lanes_max] or [1]
    dense = [d for d in cands if d * W >= 128] or cands          # lane-dense chunks
    pref = [d for d in dense if N * (H // d) >= min_rows] or dense  # >=2 grid steps
    TH = max(pref)
    HB = H // TH
    LANES = TH * W
    R = N * HB

    lanes_pad = pl.cdiv(LANES, 128) * 128            # physical lane footprint
    tn_budget = max(8, (block_bytes // (lanes_pad * 4)) // 8 * 8)  # f32 sizing
    if R <= 8:
        TN = R                                       # full (allowed: equals dim)
    else:
        half = ((pl.cdiv(R, 2) + 7) // 8) * 8        # cap so the grid has >=2 steps
        TN = max(8, min(tn_budget, half, (R // 8) * 8))
    G = pl.cdiv(R, TN)
    return TH, HB, LANES, R, TN, G


def mutu_loss(x, org, tvloss_weight=1.0, block_bytes=1 << 20):
    """Pallas implementation of mutu.forward(x, org). Returns a scalar."""
    assert x.shape == org.shape and x.ndim == 4
    B, C, H, W = x.shape
    assert H >= 2 and W >= 2, "mutu needs H >= 2 and W >= 2 (else division by zero)"
    N = B * C

    TH, HB, LANES, R, TN, G = _plan(N, H, W, block_bytes)

    # Free, contiguous views — no transpose, no pad, no dtype change.
    xf = x.reshape(R, LANES)
    of = org.reshape(R, LANES)

    kernel = functools.partial(
        _mutu_kernel, W=W, LANES=LANES, R=R, TN=TN,
        need_row_mask=(R % TN) != 0)

    partials = pl.pallas_call(
        kernel,
        out_shape=jax.ShapeDtypeStruct((G, 2, LANES), jnp.float32),
        grid=(G,),
        in_specs=[
            pl.BlockSpec((TN, LANES), lambda i: (i, 0)),
            pl.BlockSpec((TN, LANES), lambda i: (i, 0)),
        ],
        out_specs=pl.BlockSpec((1, 2, LANES), lambda i: (i, 0, 0)),
        compiler_params=pltpu.CompilerParams(
            # Each step writes its own output block -> fully parallel grid
            # (both TensorCores participate on v7x).
            dimension_semantics=("parallel",),
            vmem_limit_bytes=32 * 1024 * 1024,   # safe on v5e/v6e/v7x
        ),
    )(xf, of)

    sums = jnp.sum(partials, axis=(0, 2))            # tiny final reduce in XLA
    x_loss = sums[0]                                 # h-direction (within chunks)
    y_loss = sums[1]                                 # w-direction (complete)

    # h-differences that straddle two TH-row chunks: cheap strided-slice fix-up
    # (reads ~2/TH of each tensor, only when chunking was needed).
    if HB > 1:
        x3 = x.reshape(N, H, W)
        o3 = org.reshape(N, H, W)
        top_x = x3[:, TH - 1:H - 1:TH, :].astype(jnp.float32)
        bot_x = x3[:, TH:H:TH, :].astype(jnp.float32)
        top_o = o3[:, TH - 1:H - 1:TH, :].astype(jnp.float32)
        bot_o = o3[:, TH:H:TH, :].astype(jnp.float32)
        dxb = bot_x - top_x
        dob = bot_o - top_o
        sb = dxb * dxb + dob * dob
        x_loss = x_loss + jnp.sum(sb * jnp.exp(-10.0 * sb))

    count_h = (H - 1) * W
    count_w = H * (W - 1)
    return tvloss_weight * 2.0 * (x_loss / count_h + y_loss / count_w) / B


def _mutu_ref(x, org, tvloss_weight=1.0):
    """Pure-JAX reference for correctness check (mirrors the PyTorch module)."""
    B, C, H, W = x.shape
    count_h = (H - 1) * W
    count_w = H * (W - 1)
    h_tv = jnp.square(x[:, :, 1:, :] - x[:, :, :-1, :])
    w_tv = jnp.square(x[:, :, :, 1:] - x[:, :, :, :-1])
    oh_tv = jnp.square(org[:, :, 1:, :] - org[:, :, :-1, :])
    ow_tv = jnp.square(org[:, :, :, 1:] - org[:, :, :, :-1])
    sh = h_tv + oh_tv
    sw = w_tv + ow_tv
    x_loss = jnp.sum(sh * jnp.exp(-10.0 * sh))
    y_loss = jnp.sum(sw * jnp.exp(-10.0 * sw))
    return tvloss_weight * 2.0 * (x_loss / count_h + y_loss / count_w) / B


if __name__ == "__main__":
    # mutu has no learnable parameters; TVLoss_weight defaults to 1.
    TVLOSS_WEIGHT = 1.0

    key = jax.random.PRNGKey(0)
    kx, ko, kx2, ko2 = jax.random.split(key, 4)

    # Primary case: B=2, C=4, H=W=16 (exercises chunked H, cross-chunk fix-up,
    # and a 2-step parallel grid).
    B, C, H, W = 2, 4, 16, 16
    x = jax.random.uniform(kx, (B, C, H, W), dtype=jnp.float32)
    org = jax.random.uniform(ko, (B, C, H, W), dtype=jnp.float32)
    loss = jax.block_until_ready(mutu_loss(x, org, TVLOSS_WEIGHT))
    ref = jax.block_until_ready(_mutu_ref(x, org, TVLOSS_WEIGHT))
    assert jnp.allclose(loss, ref, rtol=1e-5, atol=1e-6), (loss, ref)

    # Secondary small case: exercises a partial (row-masked) last grid block.
    B2, C2, H2, W2 = 1, 3, 64, 16
    x2 = jax.random.uniform(kx2, (B2, C2, H2, W2), dtype=jnp.float32)
    org2 = jax.random.uniform(ko2, (B2, C2, H2, W2), dtype=jnp.float32)
    loss2 = jax.block_until_ready(mutu_loss(x2, org2, TVLOSS_WEIGHT))
    ref2 = jax.block_until_ready(_mutu_ref(x2, org2, TVLOSS_WEIGHT))
    assert jnp.allclose(loss2, ref2, rtol=1e-5, atol=1e-6), (loss2, ref2)

    print("KERNEL_OK")
</pallas_src>

<mosaic_0001>
module attributes {stable_mosaic.version = 11 : i64} {
  func.func @_mutu_kernel(%arg0: i32, %arg1: memref<8x128xf32, #tpu.memory_space<vmem>>, %arg2: memref<8x128xf32, #tpu.memory_space<vmem>>, %arg3: memref<1x2x128xf32, #tpu.memory_space<vmem>>) attributes {dimension_semantics = [#tpu.dimension_semantics<parallel>], iteration_bounds = array<i64: 2>, scalar_prefetch = 0 : i64, scratch_operands = 0 : i64, tpu.core_type = #tpu.core_type<tc>, window_params = [{transform_indices = @transform_0, window_bounds = array<i64: 8, 128>}, {transform_indices = @transform_1, window_bounds = array<i64: 8, 128>}, {transform_indices = @transform_2, window_bounds = array<i64: 1, 2, 128>}]} {
    %c0 = arith.constant 0 : index
    %c0_0 = arith.constant 0 : index
    %0 = vector.load %arg1[%c0, %c0_0] : memref<8x128xf32, #tpu.memory_space<vmem>>, vector<8x128xf32>
    %c0_1 = arith.constant 0 : index
    %c0_2 = arith.constant 0 : index
    %1 = vector.load %arg2[%c0_1, %c0_2] : memref<8x128xf32, #tpu.memory_space<vmem>>, vector<8x128xf32>
    %2 = tpu.iota {dimensions = array<i32: 1>} : vector<1x128xi32>
    %c16_i32 = arith.constant 16 : i32
    %c0_i32 = arith.constant 0 : i32
    %3 = arith.cmpi eq, %c16_i32, %c0_i32 : i32
    %c1_i32 = arith.constant 1 : i32
    %4 = arith.select %3, %c1_i32, %c16_i32 : i32
    %5 = vector.broadcast %4 : i32 to vector<1x128xi32>
    %6 = arith.remsi %2, %5 : vector<1x128xi32>
    %c0_i32_3 = arith.constant 0 : i32
    %7 = vector.broadcast %c0_i32_3 : i32 to vector<1x128xi32>
    %8 = arith.cmpi ne, %6, %7 : vector<1x128xi32>
    %c0_i32_4 = arith.constant 0 : i32
    %9 = vector.broadcast %c0_i32_4 : i32 to vector<1x128xi32>
    %10 = arith.cmpi slt, %6, %9 : vector<1x128xi32>
    %c0_i32_5 = arith.constant 0 : i32
    %11 = arith.cmpi slt, %4, %c0_i32_5 : i32
    %12 = vector.broadcast %11 : i1 to vector<1x128xi1>
    %13 = vector.broadcast %12 : vector<1x128xi1> to vector<1x128xi1>
    %14 = arith.xori %10, %13 : vector<1x128xi1>
    %15 = arith.andi %14, %8 : vector<1x128xi1>
    %16 = vector.broadcast %4 : i32 to vector<1x128xi32>
    %17 = arith.addi %6, %16 : vector<1x128xi32>
    %18 = arith.select %15, %17, %6 : vector<1x128xi1>, vector<1x128xi32>
    %c0_i32_6 = arith.constant 0 : i32
    %19 = vector.broadcast %c0_i32_6 : i32 to vector<1x128xi32>
    %20 = arith.cmpi ne, %18, %19 : vector<1x128xi32>
    %c16_i32_7 = arith.constant 16 : i32
    %21 = vector.broadcast %c16_i32_7 : i32 to vector<1x128xi32>
    %22 = arith.cmpi sge, %2, %21 : vector<1x128xi32>
    %c16_i32_8 = arith.constant 16 : i32
    %23 = tpu.dynamic_rotate %0 by %c16_i32_8 dim 1 : vector<8x128xf32>, i32 -> vector<8x128xf32>
    %24 = arith.subf %0, %23 : vector<8x128xf32>
    %c16_i32_9 = arith.constant 16 : i32
    %25 = tpu.dynamic_rotate %1 by %c16_i32_9 dim 1 : vector<8x128xf32>, i32 -> vector<8x128xf32>
    %26 = arith.subf %1, %25 : vector<8x128xf32>
    %27 = arith.mulf %24, %24 : vector<8x128xf32>
    %28 = arith.mulf %26, %26 : vector<8x128xf32>
    %29 = arith.addf %27, %28 : vector<8x128xf32>
    %cst = arith.constant 0.000000e+00 : f32
    %30 = vector.shape_cast %22 : vector<1x128xi1> to vector<1x128xi1>
    %31 = vector.broadcast %30 : vector<1x128xi1> to vector<8x128xi1>
    %32 = vector.broadcast %cst : f32 to vector<8x128xf32>
    %33 = arith.select %31, %29, %32 : vector<8x128xi1>, vector<8x128xf32>
    %cst_10 = arith.constant -1.000000e+01 : f32
    %34 = vector.broadcast %cst_10 : f32 to vector<8x128xf32>
    %35 = arith.mulf %34, %33 : vector<8x128xf32>
    %36 = math.exp %35 : vector<8x128xf32>
    %37 = arith.mulf %33, %36 : vector<8x128xf32>
    %cst_11 = arith.constant dense<0.000000e+00> : vector<128xf32>
    %38 = vector.multi_reduction <add>, %37, %cst_11 [0] : vector<8x128xf32> to vector<128xf32>
    %39 = vector.shape_cast %38 : vector<128xf32> to vector<1x128xf32>
    %c0_12 = arith.constant 0 : index
    %c0_13 = arith.constant 0 : index
    %c0_14 = arith.constant 0 : index
    %40 = vector.load %arg3[%c0_12, %c0_13, %c0_14] : memref<1x2x128xf32, #tpu.memory_space<vmem>>, vector<1x1x128xf32>
    %41 = vector.shape_cast %40 : vector<1x1x128xf32> to vector<1x128xf32>
    %42 = vector.shape_cast %39 : vector<1x128xf32> to vector<1x1x128xf32>
    tpu.vector_store %arg3[%c0_12, %c0_13, %c0_14], %42 {strides = array<i32>} : memref<1x2x128xf32, #tpu.memory_space<vmem>>, vector<1x1x128xf32>,
    %c1_i32_15 = arith.constant 1 : i32
    %43 = tpu.dynamic_rotate %0 by %c1_i32_15 dim 1 : vector<8x128xf32>, i32 -> vector<8x128xf32>
    %44 = arith.subf %0, %43 : vector<8x128xf32>
    %c1_i32_16 = arith.constant 1 : i32
    %45 = tpu.dynamic_rotate %1 by %c1_i32_16 dim 1 : vector<8x128xf32>, i32 -> vector<8x128xf32>
    %46 = arith.subf %1, %45 : vector<8x128xf32>
    %47 = arith.mulf %44, %44 : vector<8x128xf32>
    %48 = arith.mulf %46, %46 : vector<8x128xf32>
    %49 = arith.addf %47, %48 : vector<8x128xf32>
    %cst_17 = arith.constant 0.000000e+00 : f32
    %50 = vector.shape_cast %20 : vector<1x128xi1> to vector<1x128xi1>
    %51 = vector.broadcast %50 : vector<1x128xi1> to vector<8x128xi1>
    %52 = vector.broadcast %cst_17 : f32 to vector<8x128xf32>
    %53 = arith.select %51, %49, %52 : vector<8x128xi1>, vector<8x128xf32>
    %cst_18 = arith.constant -1.000000e+01 : f32
    %54 = vector.broadcast %cst_18 : f32 to vector<8x128xf32>
    %55 = arith.mulf %54, %53 : vector<8x128xf32>
    %56 = math.exp %55 : vector<8x128xf32>
    %57 = arith.mulf %53, %56 : vector<8x128xf32>
    %cst_19 = arith.constant dense<0.000000e+00> : vector<128xf32>
    %58 = vector.multi_reduction <add>, %57, %cst_19 [0] : vector<8x128xf32> to vector<128xf32>
    %59 = vector.shape_cast %58 : vector<128xf32> to vector<1x128xf32>
    %c0_20 = arith.constant 0 : index
    %c1 = arith.constant 1 : index
    %c0_21 = arith.constant 0 : index
    %60 = vector.load %arg3[%c0_20, %c1, %c0_21] : memref<1x2x128xf32, #tpu.memory_space<vmem>>, vector<1x1x128xf32>
    %61 = vector.shape_cast %60 : vector<1x1x128xf32> to vector<1x128xf32>
    %62 = vector.shape_cast %59 : vector<1x128xf32> to vector<1x1x128xf32>
    tpu.vector_store %arg3[%c0_20, %c1, %c0_21], %62 {strides = array<i32>} : memref<1x2x128xf32, #tpu.memory_space<vmem>>, vector<1x1x128xf32>,
    return
  }
  func.func @transform_0(%arg0: i32) -> (i32, i32) {
    %c0_i32 = arith.constant 0 : i32
    %c0_i32_0 = arith.constant 0 : i32
    return %arg0, %c0_i32 : i32, i32
  }
  func.func @transform_1(%arg0: i32) -> (i32, i32) {
    %c0_i32 = arith.constant 0 : i32
    %c0_i32_0 = arith.constant 0 : i32
    return %arg0, %c0_i32 : i32, i32
  }
  func.func @transform_2(%arg0: i32) -> (i32, i32, i32) {
    %c0_i32 = arith.constant 0 : i32
    %c0_i32_0 = arith.constant 0 : i32
    %c0_i32_1 = arith.constant 0 : i32
    return %arg0, %c0_i32, %c0_i32_0 : i32, i32, i32
  }
}

</mosaic_0001>

<bundles_post_ra>
// kernel: tpu_custom_call.1
= control target key start
LH: loop header
LB: loop body
LE: loop exit
PB: predicated region body
PF: predicated region fallthrough
CT: control target
= control target key end

     0   :  { %7 = vsyncpa [#allocation3], 0  ;;  %s786_s0 = inlined_call_operand.hbm [shape: f32[16,128], index: 0, kind: input, shape index: {}]   ;;  %s787_s1 = inlined_call_operand.hbm [shape: f32[16,128], index: 1, kind: input, shape index: {}]   ;;  %s788_s2 = inlined_call_operand.hbm [shape: f32[2,2,128], index: 2, kind: output, shape index: {}]  }
   0x1   :  { %9 = vsyncpa [#allocation3 + $0x1], 0 }
   0x2   :  { %10 = vsyncpa [#allocation6], 0 }
   0x3   :  { %12 = vsyncpa [#allocation6 + $0x1], 0 }
   0x4   :  { %13 = vsyncpa [#allocation4], 0 }
   0x5   :  { %15 = vsyncpa [#allocation4 + $0x1], 0  ;;  %s585_s9 = smov 0   ;;  %s587_s10 = smov 0  }
   0x6   :  { %s589_s11 = smov 0   ;;  %s591_s12 = smov 0  }
   0x7 LB: > { %s606_s13 = sadd.s32 4294967295, %s563_s12   ;;  %s367_s14 = sadd.s32 4294967294, %s563_s12   ;;  %s563_s12 = sphi %s591_s12, %s807_s12   ;;  %s559_s11 = sphi %s589_s11, %s806_s11   ;;  %s555_s10 = sphi %s587_s10, %s805_s10   ;;  %s551_s9 = sphi %s585_s9, %s804_s9  }
   0x8   : > { %s610_s15 = sadd.s32 1, %s563_s12   ;;  %s28_s16 = sadd.s32 1, %s559_s11 }
   0x9   : > { %s25_s17 = ssub.s32 %s563_s12, %s610_s15  ;;  %p35_p0 = scmp.ne.s32.totalorder %s559_s11, %s555_s10 }
   0xa   : > { %p26_p1 = scmp.eq.s32.totalorder %s25_s17, 0  ;;  %p36_p2 = scmp.eq.s32.totalorder %s563_s12, 0 }
   0xb   : > { %p41_p3 = scmp.ne.s32.totalorder %s555_s10, %s551_s9  ;;  %p42_p4 = scmp.eq.s32.totalorder %s606_s13, 0 }
   0xc   : > { %s622_s18 = scalar_select %p26_p1, %s559_s11, %s28_s16  }
   0xd   : > { %p624_p5 = por %p36_p2, %p35_p0  ;;  %p628_p6 = por %p42_p4, %p41_p3 }
   0xe   : > { %p91_p7 = scmp.eq.s32.totalorder %s606_s13, 1  ;;  %p97_p8 = scmp.eq.s32.totalorder %s367_s14, 1 }
   0xf   : > { %s792_s20 = scalar_select %p628_p6, 1, 0 }
  0x10   : > { %p399_p10 = scmp.lt.s32.totalorder %s563_s12, 2  ;;  %p635_p11 = por %p91_p7, %p35_p0 }
  0x11   : > { %p639_p12 = por %p97_p8, %p41_p3  ;;  %s644_s23 = sand.u32 1, %s559_s11  }
  0x12   : > { %s793_s21 = scalar_select %p635_p11, 1, 0 }
  0x13   : > { %s794_s22 = scalar_select %p639_p12, 1, 0 }
  0x14   : > { %s371_s24 = sshll.u32 %s563_s12, 7  ;;  %s370_s25 = sshll.u32 %s644_s23, 3 }
  0x15   : > { %s653_s28 = scalar_lea.hbm %s786_s0, %s371_s24  ;;  %s121_s29 = scalar_lea.vmem [#allocation2], %s370_s25 }
  0x16   : > { %s128_s30 = sshll.u32 %s121_s29, 4  ;;  %p659_p13 = pnand %p399_p10, %p624_p5  ;;  %s663_s30 = int_to_ptr.vmem [resolvable:$true] %s128_s30 }
  0x17   : > { %s118_s4 = scalar_lea.sflag [#allocation3], %s644_s23  ;;  %s439_s5 = scalar_lea.hbm %s653_s28, 128 }
  0x18   : > { %p440_p2 = scmp.ne.s32.totalorder %s653_s28, %s439_s5  ;;  %p441_p3 = pneg %p659_p13 }
  0x19   : > { %s444_s8 = scalar_lea.hbm %s786_s0, 256  ;;  %p445_p5 = scmp.lt.s32.totalorder %s653_s28, %s786_s0 }
  0x1a   : > { %p442_p4 = pnand %p441_p3, %p440_p2  ;;  %p446_p8 = scmp.lt.s32.totalorder %s444_s8, %s439_s5 }
  0x1c   : > { %p443_p7 = pneg %p442_p4  ;;  %p447_p10 = por %p446_p8, %p445_p5 }
  0x1e   : > { %p448_p9 = pnand %p447_p10, %p443_p7 }
  0x20   : > { %451 = shalt.err (!%p448_p9)
}
  0x21   : > { %s452_s17 = scalar_lea.vmem %s663_s30, 128  ;;  %s565_s19 = smov [#allocation2]  }
  0x22   : > { %p453_p0 = scmp.ne.s32.totalorder %s663_s30, %s452_s17  ;;  %s457_s26 = sshll.u32 %s565_s19, 4  ;;  %s458_s26 = int_to_ptr.vmem [resolvable:$false] %s457_s26 }
  0x23   : > { %s459_s27 = scalar_lea.vmem %s458_s26, 256  ;;  %p460_p1 = scmp.lt.s32.totalorder %s663_s30, %s458_s26 }
  0x24   : > { %p455_p2 = pnand %p453_p0, %p441_p3  ;;  %p461_p12 = scmp.lt.s32.totalorder %s459_s27, %s452_s17 }
  0x26   : > { %p456_p4 = pneg %p455_p2  ;;  %p462_p11 = por %p461_p12, %p460_p1 }
  0x28   : > { %p463_p5 = pnand %p462_p11, %p456_p4 }
  0x2a   : > { %466 = shalt.err (!%p463_p5)
}
  0x2b   : > { %391 = dma.hbm_to_vmem [thread:$0]  (!%p659_p13), %s653_s28, 128, %s663_s30, %s118_s4  }
  0x2c   : > { %p796_p9 = scmp.lt.s32.totalorder %s563_s12, 3  ;;  %p797_p0 = scmp.ge.s32.totalorder %s563_s12, 1 }
  0x2d   : > { %s705_s7 = scalar_lea.hbm %s787_s1, %s371_s24  ;;  %s139_s8 = scalar_lea.vmem [#allocation5], %s370_s25 }
  0x2e   : > { %p696_p7 = pnand %p797_p0, %p796_p9  ;;  %s146_s14 = sshll.u32 %s139_s8, 4  ;;  %s147_s14 = int_to_ptr.vmem [resolvable:$true] %s146_s14 }
  0x2f   : > { %s136_s28 = scalar_lea.sflag [#allocation6], %s644_s23  ;;  %s467_s30 = scalar_lea.hbm %s705_s7, 128 }
  0x30   : > { %s798_s29 = scalar_select %p696_p7, 1, 0 }
  0x31   : > { %p468_p11 = scmp.ne.s32.totalorder %s705_s7, %s467_s30  ;;  %s472_s17 = scalar_lea.hbm %s787_s1, 256 }
  0x32   : > { %p473_p8 = scmp.lt.s32.totalorder %s705_s7, %s787_s1  ;;  %p474_p10 = scmp.lt.s32.totalorder %s472_s17, %s467_s30 }
  0x33   : > { %p470_p12 = pnand %p468_p11, %p441_p3 }
  0x34   : > { %p475_p2 = por %p474_p10, %p473_p8 }
  0x35   : > { %p471_p1 = pneg %p470_p12 }
  0x37   : > { %p476_p4 = pnand %p475_p2, %p471_p1 }
  0x39   : > { %479 = shalt.err (!%p476_p4)
}
  0x3a   : > { %s480_s25 = scalar_lea.vmem %s147_s14, 128  ;;  %s566_s23 = smov [#allocation5]  }
  0x3b   : > { %p481_p5 = scmp.ne.s32.totalorder %s147_s14, %s480_s25  ;;  %s485_s26 = sshll.u32 %s566_s23, 4  ;;  %s486_s26 = int_to_ptr.vmem [resolvable:$false] %s485_s26 }
  0x3c   : > { %s487_s27 = scalar_lea.vmem %s486_s26, 256  ;;  %p488_p11 = scmp.lt.s32.totalorder %s147_s14, %s486_s26 }
  0x3d   : > { %p483_p9 = pnand %p481_p5, %p441_p3  ;;  %p489_p12 = scmp.lt.s32.totalorder %s487_s27, %s480_s25 }
  0x3f   : > { %p484_p0 = pneg %p483_p9  ;;  %p490_p6 = por %p489_p12, %p488_p11 }
  0x41   : > { %p491_p7 = pnand %p490_p6, %p484_p0 }
  0x43   : > { %494 = shalt.err (!%p491_p7)
}
  0x44   : > { %394 = dma.hbm_to_vmem [thread:$0]  (!%p659_p13), %s705_s7, 128, %s147_s14, %s136_s28  }
  0x45   : > { %p799_p1 = scmp.ne.s32.totalorder %s798_s29, 0 }
  0x46   : > { %s731_s5 = sand.u32 (!%p799_p1), 1, %s555_s10   ;;  %p800_p3 = scmp.ne.s32.totalorder (!%p799_p1), %s792_s20, 0 }
  0x47   : > { %155 = sbr.rel (%p799_p1) target bundleno = 252 (0xfc), region = 28  ;;  %s375_s6 = sshll.u32 (!%p799_p1), %s731_s5, 3 }
  0x48   : > { %s158_s8 = scalar_lea.sflag (!%p799_p1), [#allocation3], %s731_s5  ;;  %s161_s30 = scalar_lea.vmem (!%p799_p1), [#allocation2], %s375_s6 }
  0x4c   : > { %538 = dma.done.wait (%p800_p3), %s158_s8, 128  }
  0x4d   : > { %540 = vsyncadd (%p800_p3), %s158_s8, 4294967168  ;;  %s167_s3 = scalar_lea.sflag [#allocation6], %s731_s5  ;;  %s170_s7 = scalar_lea.vmem [#allocation5], %s375_s6 }
  0x4e   : > { %542 = dma.done.wait (%p800_p3), %s167_s3, 128  }
  0x4f   : > { %544 = vsyncadd (%p800_p3), %s167_s3, 4294967168  ;;  %v196_v0 = vld [vmem:[%s161_s30] sm:$0xff]  ;;  %s567_s29 = smov 1   ;;  %s568_s14 = smov 16   ;;  %v197_v1 = vld [vmem:[%s170_s7] sm:$0xff]  ;;  %v198_v2 = vlaneseq }
  0x50   : > { %237 = vrot.lane.b32.xlu1 %v196_v0, %s567_s29  ;;  %214 = vrot.lane.b32.xlu0 %v196_v0, %s568_s14  ;;  %s377_s20 = sshll.u32 %s731_s5, 1  ;;  %s379_s28 = sshll.u32 %s606_s13, 5 }
  0x51   : > { %v199_v5 = vand.u32 127, %v198_v2  ;;  %s195_s4 = scalar_lea.vmem [#allocation7], %s377_s20  ;;  %s749_s19 = scalar_lea.hbm %s788_s2, %s379_s28 }
  0x52   : > { %s274_s16 = sshll.u32 %s195_s4, 4  ;;  %s261_s25 = scalar_lea.sflag [#allocation4], %s731_s5  ;;  %s275_s16 = int_to_ptr.vmem [resolvable:$true] %s274_s16 }
  0x53   : > { %v204_v8 = vand.u32 15, %v199_v5  ;;  %vm213_vm1 = vcmp.ge.s32.totalorder %v199_v5, 16  ;;  %s495_s23 = scalar_lea.vmem %s275_s16, 32  ;;  %p801_p13 = scmp.ne.s32.totalorder %s793_s21, 0 }
  0x54   : > { %240 = vrot.lane.b32.xlu1 %v197_v1, %s567_s29  ;;  %217 = vrot.lane.b32.xlu0 %v197_v1, %s568_s14  ;;  %p496_p6 = scmp.ne.s32.totalorder %s275_s16, %s495_s23  ;;  %s569_s13 = smov [#allocation7]  }
  0x55   : > { %vm212_vm0 = vcmp.ne.s32.totalorder %v204_v8, 0  ;;  %s499_s26 = sshll.u32 %s569_s13, 4  ;;  %s500_s26 = int_to_ptr.vmem [resolvable:$false] %s499_s26 }
  0x56   : > { %p497_p7 = pnand %p496_p6, %p801_p13  ;;  %s501_s27 = scalar_lea.vmem %s500_s26, 64 }
  0x57   : > { %p502_p10 = scmp.lt.s32.totalorder %s275_s16, %s500_s26  ;;  %p503_p2 = scmp.lt.s32.totalorder %s501_s27, %s495_s23 }
  0x58   : > { %p498_p8 = pneg %p497_p7 }
  0x59   : > { %p504_p4 = por %p503_p2, %p502_p10 }
  0x5b   : > { %p505_p5 = pnand %p504_p4, %p498_p8 }
  0xc2   : > { %v238_v3 = vpop.permute.xlu1 %237  ;;  %v215_v4 = vpop.permute.xlu0 %214 }
  0xc3   : > { %v239_v6 = vsub.f32 %v196_v0, %v238_v3  ;;  %v216_v7 = vsub.f32 %v196_v0, %v215_v4 }
  0xc5   : > { %v243_v13 = vmul.f32 %v239_v6, %v239_v6  ;;  %v220_v14 = vmul.f32 %v216_v7, %v216_v7 }
  0xc6   : > { %v241_v9 = vpop.permute.xlu1 %240  ;;  %v218_v10 = vpop.permute.xlu0 %217 }
  0xc7   : > { %v242_v11 = vsub.f32 %v197_v1, %v241_v9  ;;  %v219_v12 = vsub.f32 %v197_v1, %v218_v10 }
  0xc9   : > { %v244_v15 = vmul.f32 %v242_v11, %v242_v11  ;;  %v221_v16 = vmul.f32 %v219_v12, %v219_v12 }
  0xcb   : > { %v245_v17 = vadd.f32 %v244_v15, %v243_v13  ;;  %v222_v18 = vadd.f32 %v221_v16, %v220_v14 }
  0xcd   : > { %v248_v19 = vsel %vm212_vm0, %v245_v17, 0.0  ;;  %v225_v20 = vsel %vm213_vm1, %v222_v18, 0.0 }
  0xce   : > { %v249_v21 = vmul.f32 -10.0, %v248_v19  ;;  %v226_v22 = vmul.f32 -10.0, %v225_v20 }
  0xd0   : > { %v250_v23 = vmul.f32 1.442695, %v249_v21  ;;  %v227_v24 = vmul.f32 1.442695, %v226_v22 }
  0xd2   : > { %435 = vpow2.f32 %v250_v23 }
  0xd3   : > { %437 = vpow2.f32 %v227_v24 }
  0xdf   : > { %v436_v25 = vpop.eup %435 }
  0xe0   : > { %v438_v26 = vpop.eup %437  ;;  %v252_v27 = vmul.f32 %v436_v25, %v248_v19 }
  0xe1   : > { %v229_v28 = vmul.f32 %v438_v26, %v225_v20 }
  0xe2   : > { %v253_v29 = vrot.slane %v252_v27, 4 }
  0xe3   : > { %v230_v30 = vrot.slane %v229_v28, 4 }
  0xe4   : > { %v254_v31 = vadd.f32 %v253_v29, %v252_v27 }
  0xe5   : > { %v231_v32 = vadd.f32 %v230_v30, %v229_v28 }
  0xe6   : > { %v255_v33 = vrot.slane %v254_v31, 2 }
  0xe7   : > { %v232_v34 = vrot.slane %v231_v32, 2 }
  0xe8   : > { %v256_v35 = vadd.f32 %v255_v33, %v254_v31 }
  0xe9   : > { %v233_v36 = vadd.f32 %v232_v34, %v231_v32 }
  0xea   : > { %v257_v37 = vrot.slane %v256_v35, 1 }
  0xeb   : > { %v234_v38 = vrot.slane %v233_v36, 1 }
  0xec   : > { %v258_v39 = vadd.f32 %v257_v37, %v256_v35 }
  0xed   : > { %v235_v40 = vadd.f32 %v234_v38, %v233_v36 }
  0xee   : > { %259 = vst [vmem:[%s195_s4 + $0x1] sm:$0x1] %v258_v39 }
  0xef   : > { %236 = vst [vmem:[%s195_s4] sm:$0x1] %v235_v40 }
  0xf0   : > { %508 = shalt.err (!%p505_p5)
}
  0xf1   : > { %s509_s6 = scalar_lea.hbm %s749_s19, 32  ;;  %s513_s30 = scalar_lea.hbm %s788_s2, 64 }
  0xf2   : > { %p510_p9 = scmp.ne.s32.totalorder %s749_s19, %s509_s6  ;;  %p514_p12 = scmp.lt.s32.totalorder %s749_s19, %s788_s2 }
  0xf3   : > { %p515_p1 = scmp.lt.s32.totalorder %s513_s30, %s509_s6 }
  0xf4   : > { %p511_p0 = pnand %p510_p9, %p801_p13 }
  0xf5   : > { %p516_p3 = por %p515_p1, %p514_p12 }
  0xf6   : > { %p512_p11 = pneg %p511_p0 }
  0xf8   : > { %p517_p6 = pnand %p516_p3, %p512_p11 }
  0xfa   : > { %520 = shalt.err (!%p517_p6)
}
  0xfb   : > { %386 = dma.vmem_to_hbm [thread:$0]  (%p801_p13), %s275_s16, 32, %s749_s19, %s261_s25  }
  0xfc PF: > { %s286_s29 = sand.u32 1, %s551_s9   ;;  %p802_p7 = scmp.ne.s32.totalorder %s794_s22, 0 }
  0xfd   : > { %p803_p8 = scmp.ge.s32.totalorder %s563_s12, 2  ;;  %s287_s14 = scalar_lea.sflag [#allocation4], %s286_s29 }
  0xff   : > { %p396_p10 = pnand %p803_p8, %p802_p7 }
 0x101   : > { %p397_p2 = pneg %p396_p10 }
 0x103   : > { %546 = dma.done.wait (%p397_p2), %s287_s14, 32  }
 0x104   : > { %548 = vsyncadd (%p397_p2), %s287_s14, 4294967264  ;;  %p18_p4 = scmp.ge.s32.totalorder %s610_s15, 4   ;;  %s804_s9 = smov %s555_s10 }
 0x105   : > { %s805_s10 = smov %s559_s11  ;;  %s806_s11 = smov %s622_s18 }
 0x106   : > { %s807_s12 = smov %s610_s15  ;;  %20 = sbr.rel (!%p18_p4) target bundleno = 7 (0x7), region = 86 }
 0x10b   :  { %292 = vsyncpa [#allocation3], 1 }
 0x10c   :  { %294 = vsyncpa [#allocation3 + $0x1], 1 }
 0x10d   :  { %295 = vsyncpa [#allocation6], 1 }
 0x10e   :  { %297 = vsyncpa [#allocation6 + $0x1], 1 }
 0x10f   :  { %298 = vsyncpa [#allocation4], 1 }
 0x110   :  { %300 = vsyncpa [#allocation4 + $0x1], 1 }

</bundles_post_ra>
